<compile_context>
chip_gen: v7x
topology: tpu7x:2x2x1
jax: 0.10.0
libtpu: 0.0.40
codegen_flags: <defaults>
</compile_context>

<pallas_src>
import functools

import jax
import jax.numpy as jnp
from jax.experimental import pallas as pl
from jax.experimental.pallas import tpu as pltpu

LANE = 128
SUBLANE = 8


def _round_up(x, m):
    return (x + m - 1) // m * m


# ---------------------------------------------------------------------------
# Pallas kernels
# ---------------------------------------------------------------------------

def _rgcn_kernel(a_ref, h_ref, w_ref, b_ref, o_ref, *, num_rels):
    """One dst-node tile: o = relu( sum_r A_r_tile @ (H @ W_r) + bias ).

    The relation loop is statically unrolled (R is small); MXU inputs are
    bf16, accumulation is f32, epilogue (bias + ReLU) is f32.
    """
    h = h_ref[...]                                     # (n_src, d_in) bf16
    acc = jnp.zeros(o_ref.shape, jnp.float32)
    for r in range(num_rels):                          # static unroll
        hw = jnp.dot(h, w_ref[r], preferred_element_type=jnp.float32)
        acc = acc + jnp.dot(a_ref[r], hw.astype(jnp.bfloat16),
                            preferred_element_type=jnp.float32)
    o_ref[...] = jnp.maximum(acc + b_ref[...], 0.0).astype(o_ref.dtype)


def _rgcn_cls_kernel(a_ref, h_ref, w_ref, b_ref, wc_ref, bc_ref,
                     h_out_ref, logit_ref, *, num_rels):
    """Last RGCN layer fused with the classifier: writes H and padded logits."""
    h = h_ref[...]
    acc = jnp.zeros(h_out_ref.shape, jnp.float32)
    for r in range(num_rels):                          # static unroll
        hw = jnp.dot(h, w_ref[r], preferred_element_type=jnp.float32)
        acc = acc + jnp.dot(a_ref[r], hw.astype(jnp.bfloat16),
                            preferred_element_type=jnp.float32)
    h_new = jnp.maximum(acc + b_ref[...], 0.0)         # f32
    h_out_ref[...] = h_new.astype(h_out_ref.dtype)
    logits = jnp.dot(h_new.astype(jnp.bfloat16), wc_ref[...],
                     preferred_element_type=jnp.float32) + bc_ref[...]
    logit_ref[...] = logits.astype(logit_ref.dtype)    # lane-dense (padded) store


# ---------------------------------------------------------------------------
# pallas_call wrappers
# ---------------------------------------------------------------------------

_VMEM_LIMIT = 32 * 1024 * 1024  # conservative: fits v5e/v6e/v7x scoped budgets


def _dst_tiling(n_dst):
    n_pad = _round_up(n_dst, SUBLANE)
    tile_m = min(n_pad, 256)
    n_pad = _round_up(n_pad, tile_m)
    return n_pad, tile_m


def rgcn_layer(A, H, W, bias):
    """A: (R, N_dst, N_src), H: (N_src, D_in), W: (R, D_in, D_out), bias: (D_out,)."""
    R, n_dst, n_src = A.shape
    _, d_in, d_out = W.shape

    n_dst_pad, tile_m = _dst_tiling(n_dst)
    if n_dst_pad != n_dst:
        A = jnp.pad(A, ((0, 0), (0, n_dst_pad - n_dst), (0, 0)))

    Ab = A.astype(jnp.bfloat16)
    Hb = H.astype(jnp.bfloat16)
    Wb = W.astype(jnp.bfloat16)
    bias2d = bias.reshape(1, d_out).astype(jnp.float32)

    out = pl.pallas_call(
        functools.partial(_rgcn_kernel, num_rels=R),
        out_shape=jax.ShapeDtypeStruct((n_dst_pad, d_out), jnp.float32),
        grid_spec=pltpu.PrefetchScalarGridSpec(
            num_scalar_prefetch=0,
            grid=(n_dst_pad // tile_m,),
            in_specs=[
                pl.BlockSpec((R, tile_m, n_src), lambda i: (0, i, 0)),
                pl.BlockSpec((n_src, d_in), lambda i: (0, 0)),
                pl.BlockSpec((R, d_in, d_out), lambda i: (0, 0, 0)),
                pl.BlockSpec((1, d_out), lambda i: (0, 0)),
            ],
            out_specs=pl.BlockSpec((tile_m, d_out), lambda i: (i, 0)),
        ),
        compiler_params=pltpu.CompilerParams(
            dimension_semantics=("parallel",),
            vmem_limit_bytes=_VMEM_LIMIT),
    )(Ab, Hb, Wb, bias2d)
    return out[:n_dst]


def rgcn_layer_with_classifier(A, H, W, bias, cls_w, cls_b):
    """Last layer + classifier fused in one pallas_call. Returns (H_new, logits)."""
    R, n_dst, n_src = A.shape
    _, d_in, d_out = W.shape
    out_dim = cls_w.shape[1]
    out_pad = _round_up(out_dim, LANE)   # lane-dense logits store; slice after

    n_dst_pad, tile_m = _dst_tiling(n_dst)
    if n_dst_pad != n_dst:
        A = jnp.pad(A, ((0, 0), (0, n_dst_pad - n_dst), (0, 0)))

    Ab = A.astype(jnp.bfloat16)
    Hb = H.astype(jnp.bfloat16)
    Wb = W.astype(jnp.bfloat16)
    bias2d = bias.reshape(1, d_out).astype(jnp.float32)
    wc = jnp.zeros((d_out, out_pad), jnp.bfloat16).at[:, :out_dim].set(
        cls_w.astype(jnp.bfloat16))
    bc = jnp.zeros((1, out_pad), jnp.float32).at[:, :out_dim].set(
        cls_b.reshape(1, out_dim).astype(jnp.float32))

    h_out, logits = pl.pallas_call(
        functools.partial(_rgcn_cls_kernel, num_rels=R),
        out_shape=(jax.ShapeDtypeStruct((n_dst_pad, d_out), jnp.float32),
                   jax.ShapeDtypeStruct((n_dst_pad, out_pad), jnp.float32)),
        grid_spec=pltpu.PrefetchScalarGridSpec(
            num_scalar_prefetch=0,
            grid=(n_dst_pad // tile_m,),
            in_specs=[
                pl.BlockSpec((R, tile_m, n_src), lambda i: (0, i, 0)),
                pl.BlockSpec((n_src, d_in), lambda i: (0, 0)),
                pl.BlockSpec((R, d_in, d_out), lambda i: (0, 0, 0)),
                pl.BlockSpec((1, d_out), lambda i: (0, 0)),
                pl.BlockSpec((d_out, out_pad), lambda i: (0, 0)),
                pl.BlockSpec((1, out_pad), lambda i: (0, 0)),
            ],
            out_specs=(pl.BlockSpec((tile_m, d_out), lambda i: (i, 0)),
                       pl.BlockSpec((tile_m, out_pad), lambda i: (i, 0))),
        ),
        compiler_params=pltpu.CompilerParams(
            dimension_semantics=("parallel",),
            vmem_limit_bytes=_VMEM_LIMIT),
    )(Ab, Hb, Wb, bias2d, wc, bc)
    return h_out[:n_dst], logits[:n_dst, :out_dim]


# ---------------------------------------------------------------------------
# Plain-JAX glue (graph -> dense per-relation adjacency, basis composition)
# ---------------------------------------------------------------------------

def build_rel_adjacency(src, dst, etype, norm, num_rels, n_dst, n_src):
    """A[r, d, s] = sum of norm_e over edges e = (s -> d) with etype_e == r."""
    vals = norm.reshape(-1).astype(jnp.float32)
    A = jnp.zeros((num_rels, n_dst, n_src), jnp.float32)
    return A.at[etype, dst, src].add(vals)


def compose_basis_weight(weight, w_comp, num_rels, in_feat, out_feat):
    """weight = w_comp @ weight_bases (only when num_bases < num_rels)."""
    if w_comp is None:
        return weight
    nb = weight.shape[0]
    return jnp.matmul(w_comp, weight.reshape(nb, in_feat * out_feat)).reshape(
        num_rels, in_feat, out_feat)


def entity_classify_forward(params, blocks, num_rels, h_dim):
    H = blocks[0]['node_features']
    n_layers = len(params['layers'])
    logits = None
    for li, (layer_p, block) in enumerate(zip(params['layers'], blocks)):
        W = compose_basis_weight(layer_p['weight'], layer_p['w_comp'],
                                 num_rels, h_dim, h_dim)
        A = build_rel_adjacency(block['src'], block['dst'], block['etype'],
                                block['norm'], num_rels,
                                block['n_dst'], block['n_src'])
        if li == n_layers - 1:
            # Classifier fused into the last RGCN layer's epilogue.
            H, logits = rgcn_layer_with_classifier(
                A, H, W, layer_p['h_bias'], params['cls_w'], params['cls_b'])
        else:
            H = rgcn_layer(A, H, W, layer_p['h_bias'])
        # self_loop / layer_norm disabled and dropout p=0 per EntityClassify
        # defaults, so they are identity here.
    return logits, H


# ---------------------------------------------------------------------------
# Deterministic parameter init (mirrors the PyTorch __init__ shapes)
# ---------------------------------------------------------------------------

def xavier_uniform(key, shape, gain):
    if len(shape) == 2:
        fan_in, fan_out = shape[1], shape[0]
    else:
        receptive = 1
        for s in shape[2:]:
            receptive *= s
        fan_in, fan_out = shape[1] * receptive, shape[0] * receptive
    bound = gain * (6.0 / (fan_in + fan_out)) ** 0.5
    return jax.random.uniform(key, shape, jnp.float32, -bound, bound)


if __name__ == "__main__":
    key = jax.random.PRNGKey(0)

    N = 16            # nodes (same src/dst node set for every block)
    H_DIM = 32        # h_dim
    OUT_DIM = 8       # out_dim
    NUM_RELS = 3      # num_rels
    NUM_EDGES = 64
    NUM_LAYERS = 2    # num_hidden_layers=1 -> 1 + 1 RelGraphConv layers
    # num_bases = -1  -> num_bases == num_rels -> no w_comp (basis path w/o comp)

    keys = list(jax.random.split(key, 4 * NUM_LAYERS + 8))
    k_iter = iter(keys)

    gain = 2.0 ** 0.5  # calculate_gain('relu')
    params = {'layers': []}
    for _ in range(NUM_LAYERS):
        w = xavier_uniform(next(k_iter), (NUM_RELS, H_DIM, H_DIM), gain)
        params['layers'].append({
            'weight': w,
            'w_comp': None,
            'h_bias': jnp.zeros((H_DIM,), jnp.float32),
        })
    cls_bound = 1.0 / (H_DIM ** 0.5)  # nn.Linear default init bound
    params['cls_w'] = jax.random.uniform(next(k_iter), (H_DIM, OUT_DIM),
                                         jnp.float32, -cls_bound, cls_bound)
    params['cls_b'] = jax.random.uniform(next(k_iter), (OUT_DIM,),
                                         jnp.float32, -cls_bound, cls_bound)

    blocks = []
    for _ in range(NUM_LAYERS):
        ks = jax.random.split(next(k_iter), 4)
        blocks.append({
            'src': jax.random.randint(ks[0], (NUM_EDGES,), 0, N),
            'dst': jax.random.randint(ks[1], (NUM_EDGES,), 0, N),
            'etype': jax.random.randint(ks[2], (NUM_EDGES,), 0, NUM_RELS),
            'norm': jax.random.uniform(ks[3], (NUM_EDGES, 1), jnp.float32,
                                       0.1, 1.0),
            'n_src': N,
            'n_dst': N,
        })
    blocks[0]['node_features'] = jax.random.normal(next(k_iter), (N, H_DIM),
                                                   jnp.float32)

    logits, H_out = entity_classify_forward(params, blocks, NUM_RELS, H_DIM)
    jax.block_until_ready((logits, H_out))
    assert logits.shape == (N, OUT_DIM) and H_out.shape == (N, H_DIM)
    print("KERNEL_OK")
</pallas_src>

<mosaic_0001>
module attributes {stable_mosaic.version = 11 : i64} {
  func.func @_rgcn_kernel(%arg0: i32, %arg1: memref<3x16x16xbf16, #tpu.memory_space<vmem>>, %arg2: memref<16x32xbf16, #tpu.memory_space<vmem>>, %arg3: memref<3x32x32xbf16, #tpu.memory_space<vmem>>, %arg4: memref<1x32xf32, #tpu.memory_space<vmem>>, %arg5: memref<16x32xf32, #tpu.memory_space<vmem>>) attributes {dimension_semantics = [#tpu.dimension_semantics<parallel>], iteration_bounds = array<i64: 1>, scalar_prefetch = 0 : i64, scratch_operands = 0 : i64, tpu.core_type = #tpu.core_type<tc>, window_params = [{transform_indices = @transform_0, window_bounds = array<i64: 3, 16, 16>}, {pipeline_mode = #tpu.pipeline_mode<synchronous>, transform_indices = @transform_1, window_bounds = array<i64: 16, 32>}, {pipeline_mode = #tpu.pipeline_mode<synchronous>, transform_indices = @transform_2, window_bounds = array<i64: 3, 32, 32>}, {pipeline_mode = #tpu.pipeline_mode<synchronous>, transform_indices = @transform_3, window_bounds = array<i64: 1, 32>}, {transform_indices = @transform_4, window_bounds = array<i64: 16, 32>}]} {
    %c0 = arith.constant 0 : index
    %c0_0 = arith.constant 0 : index
    %0 = vector.load %arg2[%c0, %c0_0] : memref<16x32xbf16, #tpu.memory_space<vmem>>, vector<16x32xbf16>
    %cst = arith.constant 0.000000e+00 : f32
    %1 = vector.broadcast %cst : f32 to vector<16x32xf32>
    %c0_1 = arith.constant 0 : index
    %c0_2 = arith.constant 0 : index
    %c0_3 = arith.constant 0 : index
    %2 = vector.load %arg3[%c0_1, %c0_2, %c0_3] : memref<3x32x32xbf16, #tpu.memory_space<vmem>>, vector<1x32x32xbf16>
    %3 = vector.shape_cast %2 : vector<1x32x32xbf16> to vector<32x32xbf16>
    %cst_4 = arith.constant dense<0.000000e+00> : vector<16x32xf32>
    %4 = tpu.matmul %0, %3, %cst_4 {dimension_numbers = #tpu.dot_dimension_numbers<[1], [0], [0], [1], [0, 0, 1, 1], [], []>} : vector<16x32xbf16>, vector<32x32xbf16>, vector<16x32xf32> -> vector<16x32xf32>
    %c0_5 = arith.constant 0 : index
    %c0_6 = arith.constant 0 : index
    %c0_7 = arith.constant 0 : index
    %5 = vector.load %arg1[%c0_5, %c0_6, %c0_7] : memref<3x16x16xbf16, #tpu.memory_space<vmem>>, vector<1x16x16xbf16>
    %6 = vector.shape_cast %5 : vector<1x16x16xbf16> to vector<16x16xbf16>
    %7 = arith.truncf %4 : vector<16x32xf32> to vector<16x32xbf16>
    %cst_8 = arith.constant dense<0.000000e+00> : vector<16x32xf32>
    %8 = tpu.matmul %6, %7, %cst_8 {dimension_numbers = #tpu.dot_dimension_numbers<[1], [0], [0], [1], [0, 0, 1, 1], [], []>} : vector<16x16xbf16>, vector<16x32xbf16>, vector<16x32xf32> -> vector<16x32xf32>
    %9 = arith.addf %1, %8 : vector<16x32xf32>
    %c1 = arith.constant 1 : index
    %c0_9 = arith.constant 0 : index
    %c0_10 = arith.constant 0 : index
    %10 = vector.load %arg3[%c1, %c0_9, %c0_10] : memref<3x32x32xbf16, #tpu.memory_space<vmem>>, vector<1x32x32xbf16>
    %11 = vector.shape_cast %10 : vector<1x32x32xbf16> to vector<32x32xbf16>
    %cst_11 = arith.constant dense<0.000000e+00> : vector<16x32xf32>
    %12 = tpu.matmul %0, %11, %cst_11 {dimension_numbers = #tpu.dot_dimension_numbers<[1], [0], [0], [1], [0, 0, 1, 1], [], []>} : vector<16x32xbf16>, vector<32x32xbf16>, vector<16x32xf32> -> vector<16x32xf32>
    %c1_12 = arith.constant 1 : index
    %c0_13 = arith.constant 0 : index
    %c0_14 = arith.constant 0 : index
    %13 = vector.load %arg1[%c1_12, %c0_13, %c0_14] : memref<3x16x16xbf16, #tpu.memory_space<vmem>>, vector<1x16x16xbf16>
    %14 = vector.shape_cast %13 : vector<1x16x16xbf16> to vector<16x16xbf16>
    %15 = arith.truncf %12 : vector<16x32xf32> to vector<16x32xbf16>
    %cst_15 = arith.constant dense<0.000000e+00> : vector<16x32xf32>
    %16 = tpu.matmul %14, %15, %cst_15 {dimension_numbers = #tpu.dot_dimension_numbers<[1], [0], [0], [1], [0, 0, 1, 1], [], []>} : vector<16x16xbf16>, vector<16x32xbf16>, vector<16x32xf32> -> vector<16x32xf32>
    %17 = arith.addf %9, %16 : vector<16x32xf32>
    %c2 = arith.constant 2 : index
    %c0_16 = arith.constant 0 : index
    %c0_17 = arith.constant 0 : index
    %18 = vector.load %arg3[%c2, %c0_16, %c0_17] : memref<3x32x32xbf16, #tpu.memory_space<vmem>>, vector<1x32x32xbf16>
    %19 = vector.shape_cast %18 : vector<1x32x32xbf16> to vector<32x32xbf16>
    %cst_18 = arith.constant dense<0.000000e+00> : vector<16x32xf32>
    %20 = tpu.matmul %0, %19, %cst_18 {dimension_numbers = #tpu.dot_dimension_numbers<[1], [0], [0], [1], [0, 0, 1, 1], [], []>} : vector<16x32xbf16>, vector<32x32xbf16>, vector<16x32xf32> -> vector<16x32xf32>
    %c2_19 = arith.constant 2 : index
    %c0_20 = arith.constant 0 : index
    %c0_21 = arith.constant 0 : index
    %21 = vector.load %arg1[%c2_19, %c0_20, %c0_21] : memref<3x16x16xbf16, #tpu.memory_space<vmem>>, vector<1x16x16xbf16>
    %22 = vector.shape_cast %21 : vector<1x16x16xbf16> to vector<16x16xbf16>
    %23 = arith.truncf %20 : vector<16x32xf32> to vector<16x32xbf16>
    %cst_22 = arith.constant dense<0.000000e+00> : vector<16x32xf32>
    %24 = tpu.matmul %22, %23, %cst_22 {dimension_numbers = #tpu.dot_dimension_numbers<[1], [0], [0], [1], [0, 0, 1, 1], [], []>} : vector<16x16xbf16>, vector<16x32xbf16>, vector<16x32xf32> -> vector<16x32xf32>
    %25 = arith.addf %17, %24 : vector<16x32xf32>
    %c0_23 = arith.constant 0 : index
    %c0_24 = arith.constant 0 : index
    %26 = vector.load %arg4[%c0_23, %c0_24] : memref<1x32xf32, #tpu.memory_space<vmem>>, vector<1x32xf32>
    %27 = vector.broadcast %26 : vector<1x32xf32> to vector<16x32xf32>
    %28 = arith.addf %25, %27 : vector<16x32xf32>
    %cst_25 = arith.constant 0.000000e+00 : f32
    %29 = vector.broadcast %cst_25 : f32 to vector<16x32xf32>
    %30 = arith.maximumf %28, %29 : vector<16x32xf32>
    %c0_26 = arith.constant 0 : index
    %c0_27 = arith.constant 0 : index
    %31 = vector.load %arg5[%c0_26, %c0_27] : memref<16x32xf32, #tpu.memory_space<vmem>>, vector<16x32xf32>
    tpu.vector_store %arg5[%c0_26, %c0_27], %30 {strides = array<i32>} : memref<16x32xf32, #tpu.memory_space<vmem>>, vector<16x32xf32>,
    return
  }
  func.func @transform_0(%arg0: i32) -> (i32, i32, i32) {
    %c0_i32 = arith.constant 0 : i32
    %c0_i32_0 = arith.constant 0 : i32
    %c0_i32_1 = arith.constant 0 : i32
    return %c0_i32, %arg0, %c0_i32_0 : i32, i32, i32
  }
  func.func @transform_1(%arg0: i32) -> (i32, i32) {
    %c0_i32 = arith.constant 0 : i32
    %c0_i32_0 = arith.constant 0 : i32
    %c0_i32_1 = arith.constant 0 : i32
    return %c0_i32, %c0_i32_0 : i32, i32
  }
  func.func @transform_2(%arg0: i32) -> (i32, i32, i32) {
    %c0_i32 = arith.constant 0 : i32
    %c0_i32_0 = arith.constant 0 : i32
    %c0_i32_1 = arith.constant 0 : i32
    %c0_i32_2 = arith.constant 0 : i32
    return %c0_i32, %c0_i32_0, %c0_i32_1 : i32, i32, i32
  }
  func.func @transform_3(%arg0: i32) -> (i32, i32) {
    %c0_i32 = arith.constant 0 : i32
    %c0_i32_0 = arith.constant 0 : i32
    %c0_i32_1 = arith.constant 0 : i32
    return %c0_i32, %c0_i32_0 : i32, i32
  }
  func.func @transform_4(%arg0: i32) -> (i32, i32) {
    %c0_i32 = arith.constant 0 : i32
    %c0_i32_0 = arith.constant 0 : i32
    return %arg0, %c0_i32 : i32, i32
  }
}

</mosaic_0001>

<bundles_post_ra>
// kernel: tpu_custom_call.1
= control target key start
LH: loop header
LB: loop body
LE: loop exit
PB: predicated region body
PF: predicated region fallthrough
CT: control target
= control target key end

     0   :  { %9 = vsyncpa [#allocation3], 0  ;;  %s740_s0 = inlined_call_operand.hbm [shape: bf16[3,16,16], index: 0, kind: input, shape index: {}]   ;;  %s741_s1 = inlined_call_operand.hbm [shape: bf16[16,32], index: 1, kind: input, shape index: {}]   ;;  %s742_s2 = inlined_call_operand.hbm [shape: bf16[3,32,32], index: 2, kind: input, shape index: {}]   ;;  %s743_s3 = inlined_call_operand.vmem [shape: f32[1,32], index: 3, kind: input, shape index: {}]   ;;  %s744_s4 = inlined_call_operand.hbm [shape: f32[16,32], index: 4, kind: output, shape index: {}]  }
   0x1   :  { %10 = vsyncpa [#allocation6], 0 }
   0x2   :  { %11 = vsyncpa [#allocation4], 0  ;;  %s624_s15 = smov [#allocation5]   ;;  %s625_s17 = smov [#allocation2]  }
   0x3   :  { %s29_s16 = sshll.u32 %s624_s15, 4  ;;  %s17_s18 = sshll.u32 %s625_s17, 4  ;;  %s30_s16 = int_to_ptr.vmem [resolvable:$true] %s29_s16  ;;  %s659_s18 = int_to_ptr.vmem [resolvable:$true] %s17_s18 }
   0x4   :  { %s530_s21 = scalar_lea.hbm %s741_s1, 128 }
   0x5   :  { %p531_p0 = scmp.ne.s32.totalorder %s741_s1, %s530_s21  ;;  %p534_p1 = scmp.lt.u32.totalorder %s530_s21, %s741_s1 }
   0x7   :  { %p536_p2 = pnand %p534_p1, %p531_p0 }
   0x9   :  { %539 = shalt.err (!%p536_p2)
}
   0xa   :  { %s540_s26 = scalar_lea.vmem %s30_s16, 128  ;;  %p545_p4 = scmp.lt.s32.totalorder %s30_s16, %s30_s16 }
   0xb   :  { %p541_p3 = scmp.ne.s32.totalorder %s30_s16, %s540_s26  ;;  %p546_p5 = scmp.lt.s32.totalorder %s540_s26, %s540_s26 }
   0xd   :  { %p547_p6 = por %p546_p5, %p545_p4 }
   0xf   :  { %p548_p7 = pnand %p547_p6, %p541_p3 }
  0x11   :  { %551 = shalt.err (!%p548_p7)
}
  0x12   :  { %s626_s27 = smov 64   ;;  %s627_s28 = smov 4  }
  0x13   :  { %35 = dma.hbm_to_vmem [thread:$0]  %s741_s1, 128, %s30_s16, [#allocation6], %s626_s27, %s626_s27, %s627_s28  }
  0x14   :  { %s552_s7 = scalar_lea.hbm %s740_s0, 384 }
  0x15   :  { %p553_p8 = scmp.ne.s32.totalorder %s740_s0, %s552_s7  ;;  %p556_p9 = scmp.lt.u32.totalorder %s552_s7, %s740_s0 }
  0x17   :  { %p558_p10 = pnand %p556_p9, %p553_p8 }
  0x19   :  { %561 = shalt.err (!%p558_p10)
}
  0x1a   :  { %s562_s12 = scalar_lea.vmem %s659_s18, 384  ;;  %p567_p12 = scmp.lt.s32.totalorder %s659_s18, %s659_s18 }
  0x1b   :  { %p563_p11 = scmp.ne.s32.totalorder %s659_s18, %s562_s12  ;;  %p568_p13 = scmp.lt.s32.totalorder %s562_s12, %s562_s12 }
  0x1d   :  { %p569_p0 = por %p568_p13, %p567_p12 }
  0x1f   :  { %p570_p1 = pnand %p569_p0, %p563_p11 }
  0x21   :  { %573 = shalt.err (!%p570_p1)
}
  0x22   :  { %23 = dma.hbm_to_vmem [thread:$0]  %s740_s0, 384, %s659_s18, [#allocation3], %s626_s27, %s626_s27, %s627_s28  }
  0x23   :  { %s628_s14 = smov [#allocation7]   ;;  %s574_s19 = scalar_lea.hbm %s742_s2, 768 }
  0x24   :  { %s41_s15 = sshll.u32 %s628_s14, 4  ;;  %p575_p2 = scmp.ne.s32.totalorder %s742_s2, %s574_s19  ;;  %s42_s15 = int_to_ptr.vmem [resolvable:$true] %s41_s15 }
  0x25   :  { %p578_p3 = scmp.lt.u32.totalorder %s574_s19, %s742_s2 }
  0x27   :  { %p580_p4 = pnand %p578_p3, %p575_p2 }
  0x29   :  { %583 = shalt.err (!%p580_p4)
}
  0x2a   :  { %s584_s24 = scalar_lea.vmem %s42_s15, 768  ;;  %p589_p6 = scmp.lt.s32.totalorder %s42_s15, %s42_s15 }
  0x2b   :  { %p585_p5 = scmp.ne.s32.totalorder %s42_s15, %s584_s24  ;;  %p590_p7 = scmp.lt.s32.totalorder %s584_s24, %s584_s24 }
  0x2d   :  { %p591_p8 = por %p590_p7, %p589_p6 }
  0x2f   :  { %p592_p9 = pnand %p591_p8, %p585_p5 }
  0x31   :  { %595 = shalt.err (!%p592_p9)
}
  0x32   :  { %47 = dma.hbm_to_vmem [thread:$0]  %s742_s2, 768, %s42_s15, [#allocation6], %s626_s27, %s626_s27, %s627_s28  }
  0x33   :  { %618 = dma.done.wait [#allocation3], 384  }
  0x34   :  { %619 = vsyncadd [#allocation3], 4294966912 }
  0x35   :  { %620 = dma.done.wait [#allocation6], 896  }
  0x36   :  { %621 = vsyncadd [#allocation6], 4294966400  ;;  %v629_v0 = vmov 0.0   ;;  %vm630_vm0 = vmmov 0   ;;  %v520_v1 = vld [vmem:[#allocation7] sm:$0xff]   ;;  %v521_v2 = vld [vmem:[#allocation7 + $0x10] sm:$0xff]  }
  0x37   :  { %468 = vmatprep.subr.bf16.mxu0 %v629_v0  ;;  %476 = vmatprep.subr.bf16.mxu1 %v629_v0  ;;  %v522_v3 = vld [vmem:[#allocation7 + $0x8] sm:$0xff]   ;;  %v523_v4 = vld [vmem:[#allocation7 + $0x18] sm:$0xff]   ;;  %vm83_vm1 = vcmask 261120   ;;  %v526_v16 = vld [vmem:[#allocation2] sm:$0xff]   ;;  %vm198_vm2 = vcmask 130048   ;;  %s631_s26 = smov [#allocation8]  }
  0x38   :  { %472 = vmatprep.mubr.msk.bf16.mxu0 %vm630_vm0, %v629_v0  ;;  %480 = vmatprep.mubr.msk.bf16.mxu1 %vm630_vm0, %v629_v0  ;;  %v524_v5 = vld [vmem:[#allocation5] sm:$0xff]   ;;  %v525_v17 = vld [vmem:[#allocation2 + $0x8] sm:$0xff]   ;;  %v527_v18 = vld [vmem:[#allocation7 + $0x20] sm:$0xff]   ;;  %s423_s27 = sshll.u32 %s631_s26, 4  ;;  %s424_s27 = int_to_ptr.vmem [resolvable:$true] %s423_s27 }
  0x39   :  { %469 = vmatpush3.bf16.msra.mxu0 %v520_v1  ;;  %477 = vmatpush3.bf16.msra.mxu1 %v521_v2  ;;  %v528_v19 = vld [vmem:[#allocation7 + $0x28] sm:$0xff]   ;;  %v529_v35 = vld [vmem:[#allocation2 + $0x10] sm:$0xff]   ;;  %v452_v37 = vld [vmem:[%s743_s3] ss:$0 sm:$0xff]  ;;  %s596_s28 = scalar_lea.vmem %s424_s27, 256  ;;  %p601_p11 = scmp.lt.s32.totalorder %s424_s27, %s424_s27 }
  0x3a   :  { %470 = vmatprep.subr.bf16.mxu0 %v629_v0  ;;  %478 = vmatprep.subr.bf16.mxu1 %v629_v0  ;;  %p597_p10 = scmp.ne.s32.totalorder %s424_s27, %s596_s28  ;;  %p602_p12 = scmp.lt.s32.totalorder %s596_s28, %s596_s28 }
  0x3c   :  { %p603_p13 = por %p602_p12, %p601_p11 }
  0x3d   :  { %471 = vmatpush3.bf16.msra.mxu0 %v522_v3  ;;  %479 = vmatpush3.bf16.msra.mxu1 %v523_v4 }
  0x3e   :  { %484 = vmatprep.subr.bf16.mxu0 %v629_v0  ;;  %490 = vmatprep.subr.bf16.mxu1 %v629_v0  ;;  %p604_p0 = pnand %p603_p13, %p597_p10 }
  0x40   :  { %473 = vmatmul.mubr.msk.bf16.vlgmr.msra.gmra.mrb[0].mxu0 %vm83_vm1, %v524_v5  ;;  %481 = vmatmul.mubr.msk.bf16.vlgmr.msra.gmra.mrb[0].mxu1 %vm83_vm1, %v524_v5 }
  0x41   :  { %486 = vmatprep.mubr.msk.bf16.mxu0 %vm630_vm0, %v629_v0  ;;  %492 = vmatprep.mubr.msk.bf16.mxu1 %vm630_vm0, %v629_v0 }
 0x113   :  { %v121_v6 = vpop.f32.mrb[0].mxu0  ;;  %v182_v7 = vpop.f32.mrb[0].mxu1 }
 0x114   :  { %v474_v8 = vpop.f32.mrb[1].mxu0  ;;  %v482_v9 = vpop.f32.mrb[1].mxu1 }
 0x115   :  { %v124_v10 = vpop.f32.mrb[2].mxu0  ;;  %v185_v12 = vpop.f32.mrb[2].mxu1 }
 0x116   :  { %v130_v11 = vpack.c.bf16 %v124_v10, %v121_v6  ;;  %v475_v13 = vpop.f32.mrb[3].mxu0  ;;  %v192_v14 = vpack.c.bf16 %v185_v12, %v182_v7  ;;  %v483_v15 = vpop.f32.mrb[3].mxu1 }
 0x118   :  { %491 = vmatpush3.bf16.msra.mxu1 %v130_v11  ;;  %485 = vmatpush3.bf16.msra.mxu0 %v192_v14 }
 0x119   :  { %504 = vmatprep.subr.bf16.mxu1 %v629_v0  ;;  %496 = vmatprep.subr.bf16.mxu0 %v629_v0 }
 0x11b   :  { %493 = vmatmul.mubr.msk.bf16.vlgmr.msra.gmra.mrb[4].mxu1 %vm198_vm2, %v526_v16  ;;  %487 = vmatmul.mubr.msk.bf16.vlgmr.msra.gmra.mrb[4].mxu0 %vm198_vm2, %v525_v17 }
 0x11c   :  { %506 = vmatprep.mubr.msk.bf16.mxu1 %vm630_vm0, %v629_v0  ;;  %497 = vmatpush3.bf16.msra.mxu0 %v527_v18 }
 0x11d   :  { %500 = vmatprep.mubr.msk.bf16.mxu0 %vm630_vm0, %v629_v0  ;;  %498 = vmatprep.subr.bf16.mxu0 %v629_v0 }
 0x120   :  { %499 = vmatpush3.bf16.msra.mxu0 %v528_v19 }
 0x123   :  { %501 = vmatmul.mubr.msk.bf16.vlgmr.msra.gmra.mrb[8].mxu0 %vm83_vm1, %v524_v5 }
 0x1ee   :  { %v285_v20 = vpop.f32.mrb[4].mxu1  ;;  %v236_v21 = vpop.f32.mrb[4].mxu0 }
 0x1ef   :  { %v494_v22 = vpop.f32.mrb[5].mxu1  ;;  %v286_v23 = vadd.f32 %v285_v20, %v236_v21  ;;  %v488_v24 = vpop.f32.mrb[5].mxu0 }
 0x1f0   :  { %v288_v25 = vpop.f32.mrb[6].mxu1  ;;  %v239_v26 = vpop.f32.mrb[6].mxu0 }
 0x1f1   :  { %v495_v27 = vpop.f32.mrb[7].mxu1  ;;  %v289_v28 = vadd.f32 %v288_v25, %v239_v26  ;;  %v489_v29 = vpop.f32.mrb[7].mxu0 }
 0x1f6   :  { %v343_v30 = vpop.f32.mrb[8].mxu0 }
 0x1f7   :  { %v502_v31 = vpop.f32.mrb[9].mxu0 }
 0x1f8   :  { %v346_v32 = vpop.f32.mrb[10].mxu0 }
 0x1f9   :  { %v353_v33 = vpack.c.bf16 %v346_v32, %v343_v30  ;;  %v503_v34 = vpop.f32.mrb[11].mxu0 }
 0x1fb   :  { %505 = vmatpush3.bf16.msra.mxu1 %v353_v33 }
 0x1fe   :  { %507 = vmatmul.mubr.msk.bf16.vlgmr.msra.gmra.mrb[8].mxu1 %vm198_vm2, %v529_v35 }
 0x2d1   :  { %v396_v36 = vpop.f32.mrb[8].mxu1 }
 0x2d2   :  { %v403_v38 = vadd.f32 %v396_v36, %v286_v23  ;;  %v508_v39 = vpop.f32.mrb[9].mxu1 }
 0x2d3   :  { %v399_v40 = vpop.f32.mrb[10].mxu1 }
 0x2d4   :  { %v412_v41 = vadd.f32 %v452_v37, %v403_v38  ;;  %v404_v42 = vadd.f32 %v399_v40, %v289_v28  ;;  %v509_v43 = vpop.f32.mrb[11].mxu1 }
 0x2d6   :  { %v414_v44 = vmax.f32 %v412_v41, 0.0  ;;  %v413_v45 = vadd.f32 %v452_v37, %v404_v42 }
 0x2d8   :  { %416 = vst.msk [vmem:[#allocation8] sm:$0xff] %vm83_vm1, %v414_v44  ;;  %v415_v46 = vmax.f32 %v413_v45, 0.0 }
 0x2da   :  { %417 = vst.msk [vmem:[#allocation8 + $0x8] sm:$0xff] %vm83_vm1, %v415_v46 }
 0x2db   :  { %607 = shalt.err (!%p604_p0)
}
 0x2dc   :  { %s608_s30 = scalar_lea.hbm %s744_s4, 256 }
 0x2dd   :  { %p609_p1 = scmp.ne.s32.totalorder %s744_s4, %s608_s30  ;;  %p612_p2 = scmp.lt.u32.totalorder %s608_s30, %s744_s4 }
 0x2df   :  { %p614_p3 = pnand %p612_p2, %p609_p1 }
 0x2e1   :  { %617 = shalt.err (!%p614_p3)
}
 0x2e2   :  { %s632_s9 = smov 128   ;;  %s633_s10 = smov 8  }
 0x2e3   :  { %429 = dma.vmem_to_hbm [thread:$0]  %s424_s27, 256, %s744_s4, [#allocation4], %s632_s9, %s632_s9, %s633_s10  }
 0x2e4   :  { %622 = dma.done.wait [#allocation4], 256  }
 0x2e5   :  { %623 = vsyncadd [#allocation4], 4294967040 }
 0x2e6   :  { %433 = vsyncpa [#allocation3], 1 }
 0x2e7   :  { %434 = vsyncpa [#allocation6], 1 }
 0x2e8   :  { %435 = vsyncpa [#allocation4], 1 }

</bundles_post_ra>
